<compile_context>
chip_gen: v7x
topology: tpu7x:2x2x1
jax: 0.10.0
libtpu: 0.0.40
codegen_flags: <defaults>
</compile_context>

<pallas_src>
from typing import Any, NamedTuple

import jax
import jax.numpy as jnp
from jax.experimental import pallas as pl
from jax.experimental.pallas import tpu as pltpu

_LANE = 128
_NEG_INF = -1e30  # padded-class bias: exp(-1e30 - m) underflows to exactly 0


def _round_up(n, m):
    return ((n + m - 1) // m) * m


# ----------------------------------------------------------------------------
# Kernel
# ----------------------------------------------------------------------------
def _make_kernel(n_layers, activation):
    """Fused n-layer MLP (+activation on hidden layers) + row softmax."""

    def kernel(*refs):
        x_ref, o_ref = refs[0], refs[-1]
        wb = refs[1:-1]  # w0, b0, w1, b1, ...

        h = x_ref[...]
        for l in range(n_layers):
            w = wb[2 * l][...]
            b = wb[2 * l + 1][...]          # bias kept in f32
            # bf16/f32 operands -> MXU; always accumulate in f32.
            h = jnp.dot(h.astype(w.dtype), w,
                        preferred_element_type=jnp.float32)
            h = h + b
            if l < n_layers - 1:
                h = activation(h)

        # Numerically stable softmax over the class (lane) axis == torch dim=1.
        m = jnp.max(h, axis=-1, keepdims=True)
        e = jnp.exp(h - m)
        denom = jnp.sum(e, axis=-1, keepdims=True)
        # Exact division: rows must sum to 1 (approx vrcp caused ~4e-3 drift).
        o_ref[...] = (e / denom).astype(o_ref.dtype)

    return kernel


# ----------------------------------------------------------------------------
# Hardware-aware helpers
# ----------------------------------------------------------------------------
def _device_kind():
    try:
        return jax.devices()[0].device_kind.lower()
    except Exception:  # pragma: no cover - no device info available
        return ""


def _num_tensorcores_per_chip():
    kind = _device_kind()
    # v7x exposes 2 TensorCores per chip; v5e / v6e have 1.
    if "tpu" in kind and "7" in kind:
        return 2
    return 1


def default_compute_dtype():
    kind = _device_kind()
    # bf16 feed on v6e / v7x (bf16 VPU + wide MXU, halves x DMA bytes).
    # f32 on v5e (no bf16 VPU/EUP path) and on unknown / interpret backends.
    if "tpu" in kind and ("v6" in kind or "7" in kind):
        return jnp.bfloat16
    return jnp.float32


def _choose_batch_tile(B, *, n_cores=1, row_align=8, max_tile=2048):
    """Generation-aware batch tile.

    1-TC chips (v5e/v6e): a single grid step whenever it fits the tile cap
    (splitting is pure per-step overhead).  2-TC chips (v7x): >= 2 grid steps,
    preferring an even step count so both cores get equal work."""
    if B <= row_align:
        return B

    def ok(t):
        return t >= row_align and B % t == 0 and t % row_align == 0

    if n_cores <= 1:
        if B <= max_tile:
            return B
        for t in range(max_tile - (max_tile % row_align), row_align - 1, -row_align):
            if ok(t):
                return t
        return B  # fall back to a single whole-batch block

    limit = min(max_tile, B // 2)
    best = None
    for t in range(limit - (limit % row_align), row_align - 1, -row_align):
        if ok(t):
            if (B // t) % 2 == 0:
                return t
            if best is None:
                best = t
    return best if best is not None else B


# ----------------------------------------------------------------------------
# One-time parameter preparation (hoisted out of the per-call wrapper)
# ----------------------------------------------------------------------------
class PreparedParams(NamedTuple):
    args: tuple          # (w0, b0, w1, b1, ...) padded to 128-lane widths
    dims: tuple          # (d_in, h0_pad, ..., d_out_pad)
    output_size: int     # unpadded number of classes
    compute_dtype: Any


def prepare_params(params, *, compute_dtype=None):
    """Cast weights to the compute dtype and zero-pad every hidden/output
    feature dim up to a multiple of 128 lanes.  Padded columns of the final
    layer get bias -1e30 so they contribute exactly zero softmax mass.
    Biases stay f32 (added onto the f32 MXU accumulator)."""
    if compute_dtype is None:
        compute_dtype = default_compute_dtype()
    assert len(params) >= 2 and len(params) % 2 == 0
    n_layers = len(params) // 2

    args = []
    dims = [int(jnp.shape(params[0])[0])]  # network input dim (= input_size+1)
    for l in range(n_layers):
        w = jnp.asarray(params[2 * l], jnp.float32)
        b = jnp.asarray(params[2 * l + 1], jnp.float32).reshape(1, -1)
        fan_in, fan_out = int(w.shape[0]), int(w.shape[1])
        in_pad = dims[-1]                    # rows match previous padded width
        out_pad = _round_up(fan_out, _LANE)
        w_p = jnp.zeros((in_pad, out_pad), jnp.float32)
        w_p = w_p.at[:fan_in, :fan_out].set(w)
        fill = _NEG_INF if l == n_layers - 1 else 0.0
        b_p = jnp.full((1, out_pad), fill, jnp.float32)
        b_p = b_p.at[:, :fan_out].set(b)
        args.extend([w_p.astype(compute_dtype), b_p])
        dims.append(out_pad)

    output_size = int(jnp.shape(params[-1])[-1])
    return PreparedParams(tuple(args), tuple(dims), output_size, compute_dtype)


# ----------------------------------------------------------------------------
# pallas_call builder + wrapper
# ----------------------------------------------------------------------------
def _build_call(B, dims, batch_tile, compute_dtype, activation):
    n_layers = len(dims) - 1
    d_in, d_out_pad = dims[0], dims[-1]
    grid = (B // batch_tile,)

    def _resident(shape):
        # Constant (0,0) index_map: resident across the grid, DMA'd once.
        return pl.BlockSpec(shape, lambda i: (0, 0))

    in_specs = [pl.BlockSpec((batch_tile, d_in), lambda i: (i, 0))]
    for l in range(n_layers):
        in_specs.append(_resident((dims[l], dims[l + 1])))   # weight (in, out)
        in_specs.append(_resident((1, dims[l + 1])))         # bias   (1, out)

    w_isize = jnp.dtype(compute_dtype).itemsize
    mm_flops = 2 * B * sum(dims[l] * dims[l + 1] for l in range(n_layers))
    w_bytes = sum(dims[l] * dims[l + 1] for l in range(n_layers)) * w_isize
    b_bytes = sum(dims[1:]) * 4
    cost = pl.CostEstimate(
        flops=int(mm_flops),
        transcendentals=int(B * (d_out_pad + 1)),  # exp per logit + 1/denom
        bytes_accessed=int(B * d_in * w_isize + B * d_out_pad * 4
                           + w_bytes + b_bytes),
    )

    return pl.pallas_call(
        _make_kernel(n_layers, activation),
        out_shape=jax.ShapeDtypeStruct((B, d_out_pad), jnp.float32),
        grid_spec=pltpu.PrefetchScalarGridSpec(
            num_scalar_prefetch=0,
            grid=grid,
            in_specs=in_specs,
            out_specs=pl.BlockSpec((batch_tile, d_out_pad), lambda i: (i, 0)),
        ),
        compiler_params=pltpu.CompilerParams(
            dimension_semantics=("parallel",),       # megacore-shardable batch
            vmem_limit_bytes=32 * 1024 * 1024,       # > v5e's 16 MiB default
        ),
        cost_estimate=cost,
    )


def anet_forward(x, prepared: PreparedParams, *, batch_tile=None,
                 activation=jax.nn.relu):
    """x: (B, input_size+1) -> (B, output_size) softmax probabilities (f32)."""
    B, d_in = x.shape
    assert d_in == prepared.dims[0], (d_in, prepared.dims[0])

    cdt = prepared.compute_dtype
    if x.dtype != cdt:
        x = x.astype(cdt)  # only per-call cast; weights/biases are pre-prepared

    if batch_tile is None:
        row_align = 16 if jnp.dtype(cdt).itemsize < 4 else 8
        batch_tile = _choose_batch_tile(
            B, n_cores=_num_tensorcores_per_chip(), row_align=row_align)
    assert B % batch_tile == 0, (B, batch_tile)

    fn = _build_call(B, prepared.dims, batch_tile, cdt, activation)
    out = fn(x, *prepared.args)
    return out[:, :prepared.output_size]  # drop padded classes (prob == 0)


# ----------------------------------------------------------------------------
# Init + pure-JAX reference
# ----------------------------------------------------------------------------
def init_params(key, input_size, hidden_layers, output_size):
    """Deterministic nn.Linear-style init; weights returned as (in, out)."""
    dims = [input_size + 1] + list(hidden_layers) + [output_size]
    params = []
    for fan_in, fan_out in zip(dims[:-1], dims[1:]):
        key, kw, kb = jax.random.split(key, 3)
        bound = 1.0 / (fan_in ** 0.5)
        # PyTorch stores (out, in); we directly build the transposed (in, out).
        w = jax.random.uniform(kw, (fan_in, fan_out), jnp.float32, -bound, bound)
        b = jax.random.uniform(kb, (1, fan_out), jnp.float32, -bound, bound)
        params.extend([w, b])
    return params


def reference_forward(x, params, activation=jax.nn.relu):
    n_layers = len(params) // 2
    h = x
    for l in range(n_layers):
        h = h @ params[2 * l] + params[2 * l + 1]
        if l < n_layers - 1:
            h = activation(h)
    return jax.nn.softmax(h, axis=1)


# ----------------------------------------------------------------------------
# Demo / self-test
# ----------------------------------------------------------------------------
if __name__ == "__main__":
    # Module config: input_size=15 -> network input dim 16, hidden [32, 32],
    # output 16, activation=ReLU.  Batch 256: one grid step on v5e/v6e,
    # two even "parallel" steps (tile 128) on v7x.
    input_size = 15
    hidden_layers = [32, 32]
    output_size = 16
    batch = 256

    key = jax.random.PRNGKey(0)
    key, kx = jax.random.split(key)
    x = jax.random.normal(kx, (batch, input_size + 1), jnp.float32)
    params = init_params(key, input_size, hidden_layers, output_size)

    ref = reference_forward(x, params)

    # f32 path (right default on v5e / unknown backends; works everywhere).
    prep_f32 = prepare_params(params, compute_dtype=jnp.float32)
    out = jax.block_until_ready(anet_forward(x, prep_f32))
    assert out.shape == (batch, output_size)
    assert jnp.allclose(out, ref, atol=2e-3, rtol=2e-3)
    # Exact division in the kernel -> rows sum to 1 up to f32 rounding.
    assert jnp.allclose(jnp.sum(out, axis=1), 1.0, atol=1e-4)

    # bf16-fed path (MXU/DMA fast path on v6e/v7x); accumulation, biases and
    # softmax stay f32, so rows still normalize exactly.
    prep_bf16 = prepare_params(params, compute_dtype=jnp.bfloat16)
    out_bf16 = jax.block_until_ready(anet_forward(x, prep_bf16))
    assert out_bf16.shape == (batch, output_size)
    assert jnp.allclose(out_bf16, ref, atol=5e-2)
    assert jnp.allclose(jnp.sum(out_bf16, axis=1), 1.0, atol=1e-3)

    print("KERNEL_OK")
</pallas_src>

<mosaic_0001>
module attributes {stable_mosaic.version = 11 : i64} {
  func.func @kernel(%arg0: i32, %arg1: memref<256x16xf32, #tpu.memory_space<vmem>>, %arg2: memref<16x128xf32, #tpu.memory_space<vmem>>, %arg3: memref<1x128xf32, #tpu.memory_space<vmem>>, %arg4: memref<128x128xf32, #tpu.memory_space<vmem>>, %arg5: memref<1x128xf32, #tpu.memory_space<vmem>>, %arg6: memref<128x128xf32, #tpu.memory_space<vmem>>, %arg7: memref<1x128xf32, #tpu.memory_space<vmem>>, %arg8: memref<256x128xf32, #tpu.memory_space<vmem>>) attributes {dimension_semantics = [#tpu.dimension_semantics<parallel>], iteration_bounds = array<i64: 1>, scalar_prefetch = 0 : i64, scratch_operands = 0 : i64, tpu.core_type = #tpu.core_type<tc>, window_params = [{transform_indices = @transform_0, window_bounds = array<i64: 256, 16>}, {pipeline_mode = #tpu.pipeline_mode<synchronous>, transform_indices = @transform_1, window_bounds = array<i64: 16, 128>}, {pipeline_mode = #tpu.pipeline_mode<synchronous>, transform_indices = @transform_2, window_bounds = array<i64: 1, 128>}, {pipeline_mode = #tpu.pipeline_mode<synchronous>, transform_indices = @transform_3, window_bounds = array<i64: 128, 128>}, {pipeline_mode = #tpu.pipeline_mode<synchronous>, transform_indices = @transform_4, window_bounds = array<i64: 1, 128>}, {pipeline_mode = #tpu.pipeline_mode<synchronous>, transform_indices = @transform_5, window_bounds = array<i64: 128, 128>}, {pipeline_mode = #tpu.pipeline_mode<synchronous>, transform_indices = @transform_6, window_bounds = array<i64: 1, 128>}, {transform_indices = @transform_7, window_bounds = array<i64: 256, 128>}]} {
    %c0 = arith.constant 0 : index
    %c0_0 = arith.constant 0 : index
    %0 = vector.load %arg1[%c0, %c0_0] : memref<256x16xf32, #tpu.memory_space<vmem>>, vector<256x16xf32>
    %c0_1 = arith.constant 0 : index
    %c0_2 = arith.constant 0 : index
    %1 = vector.load %arg2[%c0_1, %c0_2] : memref<16x128xf32, #tpu.memory_space<vmem>>, vector<16x128xf32>
    %c0_3 = arith.constant 0 : index
    %c0_4 = arith.constant 0 : index
    %2 = vector.load %arg3[%c0_3, %c0_4] : memref<1x128xf32, #tpu.memory_space<vmem>>, vector<1x128xf32>
    %cst = arith.constant dense<0.000000e+00> : vector<256x128xf32>
    %3 = tpu.matmul %0, %1, %cst {dimension_numbers = #tpu.dot_dimension_numbers<[1], [0], [0], [1], [0, 0, 1, 1], [], []>} : vector<256x16xf32>, vector<16x128xf32>, vector<256x128xf32> -> vector<256x128xf32>
    %4 = vector.broadcast %2 : vector<1x128xf32> to vector<256x128xf32>
    %5 = arith.addf %3, %4 : vector<256x128xf32>
    %cst_5 = arith.constant 0.000000e+00 : f32
    %6 = vector.broadcast %cst_5 : f32 to vector<256x128xf32>
    %7 = arith.maximumf %5, %6 : vector<256x128xf32>
    %c0_6 = arith.constant 0 : index
    %c0_7 = arith.constant 0 : index
    %8 = vector.load %arg4[%c0_6, %c0_7] : memref<128x128xf32, #tpu.memory_space<vmem>>, vector<128x128xf32>
    %c0_8 = arith.constant 0 : index
    %c0_9 = arith.constant 0 : index
    %9 = vector.load %arg5[%c0_8, %c0_9] : memref<1x128xf32, #tpu.memory_space<vmem>>, vector<1x128xf32>
    %cst_10 = arith.constant dense<0.000000e+00> : vector<256x128xf32>
    %10 = tpu.matmul %7, %8, %cst_10 {dimension_numbers = #tpu.dot_dimension_numbers<[1], [0], [0], [1], [0, 0, 1, 1], [], []>} : vector<256x128xf32>, vector<128x128xf32>, vector<256x128xf32> -> vector<256x128xf32>
    %11 = vector.broadcast %9 : vector<1x128xf32> to vector<256x128xf32>
    %12 = arith.addf %10, %11 : vector<256x128xf32>
    %cst_11 = arith.constant 0.000000e+00 : f32
    %13 = vector.broadcast %cst_11 : f32 to vector<256x128xf32>
    %14 = arith.maximumf %12, %13 : vector<256x128xf32>
    %c0_12 = arith.constant 0 : index
    %c0_13 = arith.constant 0 : index
    %15 = vector.load %arg6[%c0_12, %c0_13] : memref<128x128xf32, #tpu.memory_space<vmem>>, vector<128x128xf32>
    %c0_14 = arith.constant 0 : index
    %c0_15 = arith.constant 0 : index
    %16 = vector.load %arg7[%c0_14, %c0_15] : memref<1x128xf32, #tpu.memory_space<vmem>>, vector<1x128xf32>
    %cst_16 = arith.constant dense<0.000000e+00> : vector<256x128xf32>
    %17 = tpu.matmul %14, %15, %cst_16 {dimension_numbers = #tpu.dot_dimension_numbers<[1], [0], [0], [1], [0, 0, 1, 1], [], []>} : vector<256x128xf32>, vector<128x128xf32>, vector<256x128xf32> -> vector<256x128xf32>
    %18 = vector.broadcast %16 : vector<1x128xf32> to vector<256x128xf32>
    %19 = arith.addf %17, %18 : vector<256x128xf32>
    %cst_17 = arith.constant dense<0xFF800000> : vector<256xf32>
    %20 = vector.multi_reduction <maximumf>, %19, %cst_17 [1] : vector<256x128xf32> to vector<256xf32>
    %21 = vector.shape_cast %20 : vector<256xf32> to vector<256x1xf32>
    %22 = vector.broadcast %21 : vector<256x1xf32> to vector<256x128xf32>
    %23 = arith.subf %19, %22 : vector<256x128xf32>
    %24 = math.exp %23 : vector<256x128xf32>
    %cst_18 = arith.constant dense<0.000000e+00> : vector<256xf32>
    %25 = vector.multi_reduction <add>, %24, %cst_18 [1] : vector<256x128xf32> to vector<256xf32>
    %26 = vector.shape_cast %25 : vector<256xf32> to vector<256x1xf32>
    %27 = vector.broadcast %26 : vector<256x1xf32> to vector<256x128xf32>
    %28 = arith.divf %24, %27 : vector<256x128xf32>
    %c0_19 = arith.constant 0 : index
    %c0_20 = arith.constant 0 : index
    %29 = vector.load %arg8[%c0_19, %c0_20] : memref<256x128xf32, #tpu.memory_space<vmem>>, vector<256x128xf32>
    tpu.vector_store %arg8[%c0_19, %c0_20], %28 {strides = array<i32>} : memref<256x128xf32, #tpu.memory_space<vmem>>, vector<256x128xf32>,
    return
  }
  func.func @transform_0(%arg0: i32) -> (i32, i32) {
    %c0_i32 = arith.constant 0 : i32
    %c0_i32_0 = arith.constant 0 : i32
    return %arg0, %c0_i32 : i32, i32
  }
  func.func @transform_1(%arg0: i32) -> (i32, i32) {
    %c0_i32 = arith.constant 0 : i32
    %c0_i32_0 = arith.constant 0 : i32
    %c0_i32_1 = arith.constant 0 : i32
    return %c0_i32, %c0_i32_0 : i32, i32
  }
  func.func @transform_2(%arg0: i32) -> (i32, i32) {
    %c0_i32 = arith.constant 0 : i32
    %c0_i32_0 = arith.constant 0 : i32
    %c0_i32_1 = arith.constant 0 : i32
    return %c0_i32, %c0_i32_0 : i32, i32
  }
  func.func @transform_3(%arg0: i32) -> (i32, i32) {
    %c0_i32 = arith.constant 0 : i32
    %c0_i32_0 = arith.constant 0 : i32
    %c0_i32_1 = arith.constant 0 : i32
    return %c0_i32, %c0_i32_0 : i32, i32
  }
  func.func @transform_4(%arg0: i32) -> (i32, i32) {
    %c0_i32 = arith.constant 0 : i32
    %c0_i32_0 = arith.constant 0 : i32
    %c0_i32_1 = arith.constant 0 : i32
    return %c0_i32, %c0_i32_0 : i32, i32
  }
  func.func @transform_5(%arg0: i32) -> (i32, i32) {
    %c0_i32 = arith.constant 0 : i32
    %c0_i32_0 = arith.constant 0 : i32
    %c0_i32_1 = arith.constant 0 : i32
    return %c0_i32, %c0_i32_0 : i32, i32
  }
  func.func @transform_6(%arg0: i32) -> (i32, i32) {
    %c0_i32 = arith.constant 0 : i32
    %c0_i32_0 = arith.constant 0 : i32
    %c0_i32_1 = arith.constant 0 : i32
    return %c0_i32, %c0_i32_0 : i32, i32
  }
  func.func @transform_7(%arg0: i32) -> (i32, i32) {
    %c0_i32 = arith.constant 0 : i32
    %c0_i32_0 = arith.constant 0 : i32
    return %arg0, %c0_i32 : i32, i32
  }
}

</mosaic_0001>

<bundles_post_ra>
// kernel: tpu_custom_call.1
= control target key start
LH: loop header
LB: loop body
LE: loop exit
PB: predicated region body
PF: predicated region fallthrough
CT: control target
= control target key end

     0   :  { %vm68_vm0 = vcmask 130048   ;;  %s2561_s0 = inlined_call_operand.vmem [shape: f32[256,16], index: 0, kind: input, shape index: {}]   ;;  %s2562_s1 = inlined_call_operand.vmem [shape: f32[16,128], index: 1, kind: input, shape index: {}]   ;;  %s2563_s2 = inlined_call_operand.vmem [shape: f32[1,128], index: 2, kind: input, shape index: {}]   ;;  %s2564_s3 = inlined_call_operand.vmem [shape: f32[128,128], index: 3, kind: input, shape index: {}]   ;;  %s2565_s4 = inlined_call_operand.vmem [shape: f32[1,128], index: 4, kind: input, shape index: {}]   ;;  %s2566_s5 = inlined_call_operand.vmem [shape: f32[128,128], index: 5, kind: input, shape index: {}]   ;;  %s2567_s6 = inlined_call_operand.vmem [shape: f32[1,128], index: 6, kind: input, shape index: {}]   ;;  %s2568_s7 = inlined_call_operand.hbm [shape: f32[256,128], index: 7, kind: output, shape index: {}]  }
   0x1   :  { %v59_v0 = vld [vmem:[%s2562_s1] sm:$0xff]  ;;  %v60_v1 = vld [vmem:[%s2562_s1 + $0x8] sm:$0xff]  ;;  %v29_v5 = vld [vmem:[%s2561_s0 + $0x10] sm:$0xff] }
   0x2   :  { %v27_v2 = vld [vmem:[%s2561_s0] sm:$0xff]  ;;  %v1663_v3 = vpack.c.bf16 %v60_v1, %v59_v0  ;;  %v28_v4 = vld [vmem:[%s2561_s0 + $0x8] sm:$0xff]  ;;  %v45_v8 = vld [vmem:[%s2561_s0 + $0x90] sm:$0xff] }
   0x3   :  { %1455 = vmatprep.mubr.msk.f32.mxu0 %vm68_vm0, %v27_v2  ;;  %v43_v6 = vld [vmem:[%s2561_s0 + $0x80] sm:$0xff]  ;;  %v44_v7 = vld [vmem:[%s2561_s0 + $0x88] sm:$0xff]  ;;  %v30_v9 = vld [vmem:[%s2561_s0 + $0x18] sm:$0xff] }
   0x4   :  { %1664 = vmatprep.subr.bf16.mxu0 %v1663_v3  ;;  %1731 = vmatprep.subr.bf16.mxu1 %v1663_v3  ;;  %v31_v10 = vld [vmem:[%s2561_s0 + $0x20] sm:$0xff]  ;;  %v46_v11 = vld [vmem:[%s2561_s0 + $0x98] sm:$0xff]  ;;  %v423_v14 = vld [vmem:[%s2564_s3 + $0x8] sm:$0xff] }
   0x5   :  { %1666 = vmatpush3.bf16.msra.mxu0 %v1663_v3  ;;  %1732 = vmatpush3.bf16.msra.mxu1 %v1663_v3  ;;  %v47_v12 = vld [vmem:[%s2561_s0 + $0xa0] sm:$0xff]  ;;  %v32_v15 = vld [vmem:[%s2561_s0 + $0x28] sm:$0xff]  ;;  %v424_v17 = vld [vmem:[%s2564_s3 + $0x10] sm:$0xff] }
   0x6   :  { %1479 = vmatprep.mubr.msk.f32.mxu1 %vm68_vm0, %v43_v6  ;;  %v422_v13 = vld [vmem:[%s2564_s3] sm:$0xff]  ;;  %v425_v18 = vld [vmem:[%s2564_s3 + $0x18] sm:$0xff]  ;;  %v33_v19 = vld [vmem:[%s2561_s0 + $0x30] sm:$0xff] }
   0x7   :  { %v1667_v16 = vpack.c.bf16 %v423_v14, %v422_v13  ;;  %v48_v20 = vld [vmem:[%s2561_s0 + $0xa8] sm:$0xff]  ;;  %v1671_v21 = vpack.c.bf16 %v425_v18, %v424_v17  ;;  %v49_v22 = vld [vmem:[%s2561_s0 + $0xb0] sm:$0xff]  ;;  %v426_v23 = vld [vmem:[%s2564_s3 + $0x20] sm:$0xff] }
   0x8   :  { %1456 = vmatmul.mubr.msk.f32.vlgmr.msra.gmra.mrb[0].mxu0 %vm68_vm0, %v28_v4  ;;  %1480 = vmatmul.mubr.msk.f32.vlgmr.msra.gmra.mrb[0].mxu1 %vm68_vm0, %v44_v7  ;;  %v427_v24 = vld [vmem:[%s2564_s3 + $0x28] sm:$0xff]  ;;  %v34_v25 = vld [vmem:[%s2561_s0 + $0x38] sm:$0xff] }
   0x9   :  { %1458 = vmatprep.mubr.msk.f32.mxu0 %vm68_vm0, %v29_v5  ;;  %1482 = vmatprep.mubr.msk.f32.mxu1 %vm68_vm0, %v45_v8 }
   0xa   :  { %1668 = vmatprep.subr.bf16.mxu1 %v1667_v16 }
   0xb   :  { %1670 = vmatpush3.bf16.msra.mxu1 %v1667_v16 }
   0xc   :  { %1459 = vmatmul.mubr.msk.f32.gmra.mrb[2].mxu0 %vm68_vm0, %v30_v9  ;;  %1483 = vmatmul.mubr.msk.f32.gmra.mrb[2].mxu1 %vm68_vm0, %v46_v11 }
   0xd   :  { %1461 = vmatprep.mubr.msk.f32.mxu0 %vm68_vm0, %v31_v10  ;;  %1485 = vmatprep.mubr.msk.f32.mxu1 %vm68_vm0, %v47_v12 }
  0x10   :  { %1462 = vmatmul.mubr.msk.f32.gmra.mrb[4].mxu0 %vm68_vm0, %v32_v15  ;;  %1486 = vmatmul.mubr.msk.f32.gmra.mrb[4].mxu1 %vm68_vm0, %v48_v20 }
  0x11   :  { %1464 = vmatprep.mubr.msk.f32.mxu0 %vm68_vm0, %v33_v19 }
  0x12   :  { %12 = vsyncpa [#allocation3], 0  ;;  %v35_v26 = vld [vmem:[%s2561_s0 + $0x40] sm:$0xff]  ;;  %1488 = vmatprep.mubr.msk.f32.mxu1 %vm68_vm0, %v49_v22  ;;  %v50_v27 = vld [vmem:[%s2561_s0 + $0xb8] sm:$0xff]  ;;  %1672 = vmatprep.subr.bf16.mxu1 %v1671_v21  ;;  %v1675_v28 = vpack.c.bf16 %v427_v24, %v426_v23 }
  0x13   :  { %v51_v29 = vld [vmem:[%s2561_s0 + $0xc0] sm:$0xff]  ;;  %v428_v30 = vld [vmem:[%s2564_s3 + $0x30] sm:$0xff]  ;;  %v429_v31 = vld [vmem:[%s2564_s3 + $0x38] sm:$0xff]  ;;  %1674 = vmatpush3.bf16.msra.mxu1 %v1671_v21 }
  0x14   :  { %1465 = vmatmul.mubr.msk.f32.gmra.mrb[6].mxu0 %vm68_vm0, %v34_v25  ;;  %v36_v32 = vld [vmem:[%s2561_s0 + $0x48] sm:$0xff]  ;;  %1489 = vmatmul.mubr.msk.f32.gmra.mrb[6].mxu1 %vm68_vm0, %v50_v27  ;;  %v37_v33 = vld [vmem:[%s2561_s0 + $0x50] sm:$0xff]  ;;  %v1679_v35 = vpack.c.bf16 %v429_v31, %v428_v30  ;;  %v430_v37 = vld [vmem:[%s2564_s3 + $0x40] sm:$0xff] }
  0x15   :  { %1467 = vmatprep.mubr.msk.f32.mxu0 %vm68_vm0, %v35_v26  ;;  %1491 = vmatprep.mubr.msk.f32.mxu1 %vm68_vm0, %v51_v29  ;;  %v52_v34 = vld [vmem:[%s2561_s0 + $0xc8] sm:$0xff]  ;;  %v53_v36 = vld [vmem:[%s2561_s0 + $0xd0] sm:$0xff]  ;;  %v38_v39 = vld [vmem:[%s2561_s0 + $0x58] sm:$0xff] }
  0x16   :  { %1676 = vmatprep.subr.bf16.mxu1 %v1675_v28  ;;  %v431_v38 = vld [vmem:[%s2564_s3 + $0x48] sm:$0xff]  ;;  %v39_v40 = vld [vmem:[%s2561_s0 + $0x60] sm:$0xff]  ;;  %v54_v41 = vld [vmem:[%s2561_s0 + $0xd8] sm:$0xff] }
  0x17   :  { %1678 = vmatpush3.bf16.msra.mxu1 %v1675_v28  ;;  %v1683_v42 = vpack.c.bf16 %v431_v38, %v430_v37  ;;  %v55_v43 = vld [vmem:[%s2561_s0 + $0xe0] sm:$0xff]  ;;  %v432_v44 = vld [vmem:[%s2564_s3 + $0x50] sm:$0xff]  ;;  %v433_v45 = vld [vmem:[%s2564_s3 + $0x58] sm:$0xff] }
  0x18   :  { %1468 = vmatmul.mubr.msk.f32.gmra.mrb[8].mxu0 %vm68_vm0, %v36_v32  ;;  %1492 = vmatmul.mubr.msk.f32.gmra.mrb[8].mxu1 %vm68_vm0, %v52_v34  ;;  %v40_v46 = vld [vmem:[%s2561_s0 + $0x68] sm:$0xff]  ;;  %v41_v47 = vld [vmem:[%s2561_s0 + $0x70] sm:$0xff]  ;;  %v1687_v49 = vpack.c.bf16 %v433_v45, %v432_v44  ;;  %v434_v50 = vld [vmem:[%s2564_s3 + $0x60] sm:$0xff] }
  0x19   :  { %1470 = vmatprep.mubr.msk.f32.mxu0 %vm68_vm0, %v37_v33  ;;  %1494 = vmatprep.mubr.msk.f32.mxu1 %vm68_vm0, %v53_v36  ;;  %v56_v48 = vld [vmem:[%s2561_s0 + $0xe8] sm:$0xff]  ;;  %v57_v52 = vld [vmem:[%s2561_s0 + $0xf0] sm:$0xff]  ;;  %v42_v53 = vld [vmem:[%s2561_s0 + $0x78] sm:$0xff] }
  0x1a   :  { %1680 = vmatprep.subr.bf16.mxu1 %v1679_v35  ;;  %v435_v51 = vld [vmem:[%s2564_s3 + $0x68] sm:$0xff]  ;;  %v58_v55 = vld [vmem:[%s2561_s0 + $0xf8] sm:$0xff]  ;;  %v436_v56 = vld [vmem:[%s2564_s3 + $0x70] sm:$0xff] }
  0x1b   :  { %1682 = vmatpush3.bf16.msra.mxu1 %v1679_v35  ;;  %v1691_v54 = vpack.c.bf16 %v435_v51, %v434_v50  ;;  %v437_v57 = vld [vmem:[%s2564_s3 + $0x78] sm:$0xff]  ;;  %v702_v59 = vld [vmem:[%s2566_s5] sm:$0xff]  ;;  %v703_v60 = vld [vmem:[%s2566_s5 + $0x8] sm:$0xff] }
  0x1c   :  { %1471 = vmatmul.mubr.msk.f32.gmra.mrb[10].mxu0 %vm68_vm0, %v38_v39  ;;  %1495 = vmatmul.mubr.msk.f32.gmra.mrb[10].mxu1 %vm68_vm0, %v54_v41  ;;  %v1695_v58 = vpack.c.bf16 %v437_v57, %v436_v56  ;;  %v704_v61 = vld [vmem:[%s2566_s5 + $0x10] sm:$0xff]  ;;  %v1699_v62 = vpack.c.bf16 %v703_v60, %v702_v59  ;;  %v705_v63 = vld [vmem:[%s2566_s5 + $0x18] sm:$0xff]  ;;  %v706_v1 = vld [vmem:[%s2566_s5 + $0x20] sm:$0xff] }
  0x1d   :  { %1473 = vmatprep.mubr.msk.f32.mxu0 %vm68_vm0, %v39_v40  ;;  %1497 = vmatprep.mubr.msk.f32.mxu1 %vm68_vm0, %v55_v43  ;;  %v1703_v0 = vpack.c.bf16 %v705_v63, %v704_v61  ;;  %v707_v2 = vld [vmem:[%s2566_s5 + $0x28] sm:$0xff]  ;;  %v708_v4 = vld [vmem:[%s2566_s5 + $0x30] sm:$0xff]  ;;  %v709_v5 = vld [vmem:[%s2566_s5 + $0x38] sm:$0xff] }
  0x1e   :  { %1684 = vmatprep.subr.bf16.mxu1 %v1683_v42  ;;  %1700 = vmatprep.subr.bf16.mxu0 %v1699_v62  ;;  %v1707_v3 = vpack.c.bf16 %v707_v2, %v706_v1  ;;  %v1711_v6 = vpack.c.bf16 %v709_v5, %v708_v4  ;;  %v710_v7 = vld [vmem:[%s2566_s5 + $0x40] sm:$0xff]  ;;  %v711_v8 = vld [vmem:[%s2566_s5 + $0x48] sm:$0xff]  ;;  %v712_v10 = vld [vmem:[%s2566_s5 + $0x50] sm:$0xff] }
  0x1f   :  { %1686 = vmatpush3.bf16.msra.mxu1 %v1683_v42  ;;  %1702 = vmatpush3.bf16.msra.mxu0 %v1699_v62  ;;  %v1715_v9 = vpack.c.bf16 %v711_v8, %v710_v7  ;;  %v713_v11 = vld [vmem:[%s2566_s5 + $0x58] sm:$0xff]  ;;  %v714_v13 = vld [vmem:[%s2566_s5 + $0x60] sm:$0xff]  ;;  %v715_v14 = vld [vmem:[%s2566_s5 + $0x68] sm:$0xff] }
  0x20   :  { %1474 = vmatmul.mubr.msk.f32.gmra.mrb[12].mxu0 %vm68_vm0, %v40_v46  ;;  %1498 = vmatmul.mubr.msk.f32.gmra.mrb[12].mxu1 %vm68_vm0, %v56_v48  ;;  %v1719_v12 = vpack.c.bf16 %v713_v11, %v712_v10  ;;  %v1723_v15 = vpack.c.bf16 %v715_v14, %v714_v13  ;;  %v2158_v16 = vld [vmem:[%s2563_s2] ss:$0 sm:$0xff] }
  0x21   :  { %1476 = vmatprep.mubr.msk.f32.mxu0 %vm68_vm0, %v41_v47  ;;  %1500 = vmatprep.mubr.msk.f32.mxu1 %vm68_vm0, %v57_v52 }
  0x22   :  { %1688 = vmatprep.subr.bf16.mxu1 %v1687_v49  ;;  %1704 = vmatprep.subr.bf16.mxu0 %v1703_v0 }
  0x23   :  { %1690 = vmatpush3.bf16.msra.mxu1 %v1687_v49  ;;  %1706 = vmatpush3.bf16.msra.mxu0 %v1703_v0 }
  0x24   :  { %1477 = vmatmul.mubr.msk.f32.gmra.mrb[14].mxu0 %vm68_vm0, %v42_v53  ;;  %1501 = vmatmul.mubr.msk.f32.gmra.mrb[14].mxu1 %vm68_vm0, %v58_v55 }
  0x25   :  { %1692 = vmatprep.subr.bf16.mxu1 %v1691_v54  ;;  %1708 = vmatprep.subr.bf16.mxu0 %v1707_v3 }
  0x27   :  { %1694 = vmatpush3.bf16.msra.mxu1 %v1691_v54  ;;  %1710 = vmatpush3.bf16.msra.mxu0 %v1707_v3 }
  0x28   :  { %1696 = vmatprep.subr.bf16.mxu1 %v1695_v58  ;;  %1712 = vmatprep.subr.bf16.mxu0 %v1711_v6 }
  0x2b   :  { %1698 = vmatpush3.bf16.msra.mxu1 %v1695_v58  ;;  %1714 = vmatpush3.bf16.msra.mxu0 %v1711_v6 }
  0x2c   :  { %1716 = vmatprep.subr.bf16.mxu0 %v1715_v9 }
  0x2f   :  { %1718 = vmatpush3.bf16.msra.mxu0 %v1715_v9 }
  0x30   :  { %1720 = vmatprep.subr.bf16.mxu0 %v1719_v12 }
  0x33   :  { %1722 = vmatpush3.bf16.msra.mxu0 %v1719_v12 }
  0x34   :  { %1724 = vmatprep.subr.bf16.mxu0 %v1723_v15 }
  0x37   :  { %1726 = vmatpush3.bf16.msra.mxu0 %v1723_v15 }
  0xdb   :  { %v1457_v17 = vpop.f32.mrb[0].mxu0  ;;  %v2161_v20 = vpop.f32.mrb[0].mxu1 }
  0xdc   :  { %v237_v18 = vadd.f32 %v1457_v17, %v2158_v16  ;;  %v231_v19 = vpop.f32.mrb[1].mxu0  ;;  %v2164_v22 = vpop.f32.mrb[1].mxu1 }
  0xdd   :  { %v232_v21 = vadd.f32 %v2158_v16, %v231_v19  ;;  %v312_v10 = vadd.f32 %v2158_v16, %v2164_v22 }
  0xde   :  { %v391_v25 = vmax.f32 %v237_v18, 0.0  ;;  %v317_v18 = vadd.f32 %v2161_v20, %v2158_v16 }
  0xdf   :  { %v390_v23 = vmax.f32 %v232_v21, 0.0  ;;  %v1460_v24 = vpop.f32.mrb[2].mxu0  ;;  %v2167_v28 = vpop.f32.mrb[2].mxu1  ;;  %v406_v21 = vmax.f32 %v312_v10, 0.0 }
  0xe0   :  { %v247_v26 = vadd.f32 %v1460_v24, %v2158_v16  ;;  %v241_v27 = vpop.f32.mrb[3].mxu0  ;;  %v2170_v30 = vpop.f32.mrb[3].mxu1  ;;  %v407_v22 = vmax.f32 %v317_v18, 0.0  ;;  %v327_v24 = vadd.f32 %v2167_v28, %v2158_v16 }
  0xe1   :  { %v242_v29 = vadd.f32 %v2158_v16, %v241_v27  ;;  %1535 = vmatprep.mubr.f32.mxu1 %v390_v23  ;;  %v322_v23 = vadd.f32 %v2158_v16, %v2170_v30 }
  0xe2   :  { %1536 = vmatmul.mubr.f32.vlgmr.msra.gmra.mrb[16].mxu1 %v391_v25  ;;  %v393_v33 = vmax.f32 %v247_v26, 0.0  ;;  %v409_v27 = vmax.f32 %v327_v24, 0.0 }
  0xe3   :  { %v392_v31 = vmax.f32 %v242_v29, 0.0  ;;  %v1463_v32 = vpop.f32.mrb[4].mxu0  ;;  %v2173_v36 = vpop.f32.mrb[4].mxu1  ;;  %v408_v25 = vmax.f32 %v322_v23, 0.0 }
  0xe4   :  { %v257_v34 = vadd.f32 %v1463_v32, %v2158_v16  ;;  %v251_v35 = vpop.f32.mrb[5].mxu0  ;;  %v2176_v38 = vpop.f32.mrb[5].mxu1  ;;  %v337_v20 = vadd.f32 %v2173_v36, %v2158_v16 }
  0xe5   :  { %v252_v37 = vadd.f32 %v2158_v16, %v251_v35  ;;  %1538 = vmatprep.mubr.f32.mxu1 %v392_v31  ;;  %v332_v26 = vadd.f32 %v2158_v16, %v2176_v38 }
  0xe6   :  { %v395_v39 = vmax.f32 %v257_v34, 0.0  ;;  %1539 = vmatmul.mubr.f32.gmra.mrb[18].mxu1 %v393_v33  ;;  %v411_v31 = vmax.f32 %v337_v20, 0.0 }
  0xe7   :  { %v394_v40 = vmax.f32 %v252_v37, 0.0  ;;  %v1466_v41 = vpop.f32.mrb[6].mxu0  ;;  %v2179_v44 = vpop.f32.mrb[6].mxu1  ;;  %v410_v29 = vmax.f32 %v332_v26, 0.0 }
  0xe8   :  { %v267_v42 = vadd.f32 %v1466_v41, %v2158_v16  ;;  %v261_v43 = vpop.f32.mrb[7].mxu0  ;;  %v341_v46 = vpop.f32.mrb[7].mxu1  ;;  %v347_v32 = vadd.f32 %v2179_v44, %v2158_v16 }
  0xe9   :  { %v262_v45 = vadd.f32 %v2158_v16, %v261_v43  ;;  %1541 = vmatprep.mubr.f32.mxu1 %v394_v40  ;;  %v342_v30 = vadd.f32 %v2158_v16, %v341_v46 }
  0xea   :  { %v397_v47 = vmax.f32 %v267_v42, 0.0  ;;  %1542 = vmatmul.mubr.f32.gmra.mrb[20].mxu1 %v395_v39  ;;  %v413_v34 = vmax.f32 %v347_v32, 0.0 }
  0xeb   :  { %v396_v48 = vmax.f32 %v262_v45, 0.0  ;;  %v1469_v49 = vpop.f32.mrb[8].mxu0  ;;  %v1493_v52 = vpop.f32.mrb[8].mxu1  ;;  %v412_v28 = vmax.f32 %v342_v30, 0.0 }
  0xec   :  { %v277_v50 = vadd.f32 %v1469_v49, %v2158_v16  ;;  %v271_v51 = vpop.f32.mrb[9].mxu0  ;;  %v351_v54 = vpop.f32.mrb[9].mxu1  ;;  %v357_v35 = vadd.f32 %v1493_v52, %v2158_v16 }
  0xed   :  { %v272_v53 = vadd.f32 %v2158_v16, %v271_v51  ;;  %1544 = vmatprep.mubr.f32.mxu1 %v396_v48  ;;  %v352_v33 = vadd.f32 %v2158_v16, %v351_v54  ;;  %v717_v51 = vld [vmem:[%s2566_s5 + $0x78] sm:$0xff] }
  0xee   :  { %v399_v55 = vmax.f32 %v277_v50, 0.0  ;;  %1545 = vmatmul.mubr.f32.gmra.mrb[22].mxu1 %v397_v47  ;;  %v415_v38 = vmax.f32 %v357_v35, 0.0  ;;  %v716_v50 = vld [vmem:[%s2566_s5 + $0x70] sm:$0xff] }
  0xef   :  { %v398_v56 = vmax.f32 %v272_v53, 0.0  ;;  %v1472_v57 = vpop.f32.mrb[10].mxu0  ;;  %v1496_v60 = vpop.f32.mrb[10].mxu1  ;;  %v414_v37 = vmax.f32 %v352_v33, 0.0  ;;  %v1727_v52 = vpack.c.bf16 %v717_v51, %v716_v50 }
  0xf0   :  { %v287_v58 = vadd.f32 %v1472_v57, %v2158_v16  ;;  %v281_v59 = vpop.f32.mrb[11].mxu0  ;;  %v361_v62 = vpop.f32.mrb[11].mxu1  ;;  %v367_v39 = vadd.f32 %v1496_v60, %v2158_v16 }
  0xf1   :  { %v282_v61 = vadd.f32 %v2158_v16, %v281_v59  ;;  %1547 = vmatprep.mubr.f32.mxu1 %v398_v56  ;;  %v362_v36 = vadd.f32 %v2158_v16, %v361_v62  ;;  %1728 = vmatprep.subr.bf16.mxu0 %v1727_v52 }
  0xf2   :  { %v401_v63 = vmax.f32 %v287_v58, 0.0  ;;  %1548 = vmatmul.mubr.f32.gmra.mrb[24].mxu1 %v399_v55  ;;  %v417_v42 = vmax.f32 %v367_v39, 0.0  ;;  %1730 = vmatpush3.bf16.msra.mxu0 %v1727_v52 }
  0xf3   :  { %v400_v0 = vmax.f32 %v282_v61, 0.0  ;;  %v1475_v1 = vpop.f32.mrb[12].mxu0  ;;  %v1499_v4 = vpop.f32.mrb[12].mxu1  ;;  %v416_v40 = vmax.f32 %v362_v36, 0.0 }
  0xf4   :  { %v297_v2 = vadd.f32 %v1475_v1, %v2158_v16  ;;  %v291_v3 = vpop.f32.mrb[13].mxu0  ;;  %v371_v6 = vpop.f32.mrb[13].mxu1  ;;  %v377_v43 = vadd.f32 %v1499_v4, %v2158_v16 }
  0xf5   :  { %v292_v5 = vadd.f32 %v2158_v16, %v291_v3  ;;  %1550 = vmatprep.mubr.f32.mxu1 %v400_v0  ;;  %v372_v41 = vadd.f32 %v2158_v16, %v371_v6 }
  0xf6   :  { %v403_v7 = vmax.f32 %v297_v2, 0.0  ;;  %1551 = vmatmul.mubr.f32.gmra.mrb[26].mxu1 %v401_v63  ;;  %v419_v46 = vmax.f32 %v377_v43, 0.0 }
  0xf7   :  { %v402_v8 = vmax.f32 %v292_v5, 0.0  ;;  %v1478_v9 = vpop.f32.mrb[14].mxu0  ;;  %v1502_v13 = vpop.f32.mrb[14].mxu1  ;;  %v418_v44 = vmax.f32 %v372_v41, 0.0 }
  0xf8   :  { %v307_v11 = vadd.f32 %v1478_v9, %v2158_v16  ;;  %v301_v12 = vpop.f32.mrb[15].mxu0  ;;  %v381_v15 = vpop.f32.mrb[15].mxu1  ;;  %v387_v47 = vadd.f32 %v1502_v13, %v2158_v16 }
  0xf9   :  { %v302_v14 = vadd.f32 %v2158_v16, %v301_v12  ;;  %1553 = vmatprep.mubr.f32.mxu1 %v402_v8  ;;  %v382_v45 = vadd.f32 %v2158_v16, %v381_v15  ;;  %v2222_v16 = vld [vmem:[%s2565_s4] ss:$0 sm:$0xff] }
  0xfa   :  { %v405_v17 = vmax.f32 %v307_v11, 0.0  ;;  %1554 = vmatmul.mubr.f32.gmra.mrb[28].mxu1 %v403_v7  ;;  %v421_v49 = vmax.f32 %v387_v47, 0.0 }
  0xfb   :  { %v404_v19 = vmax.f32 %v302_v14, 0.0  ;;  %v420_v48 = vmax.f32 %v382_v45, 0.0 }
  0xfd   :  { %1556 = vmatprep.mubr.f32.mxu1 %v404_v19 }
  0xfe   :  { %1557 = vmatmul.mubr.f32.gmra.mrb[30].mxu1 %v405_v17 }
  0xff   :  { %1559 = vmatprep.mubr.f32.mxu1 %v406_v21 }
 0x102   :  { %1560 = vmatmul.mubr.f32.gmra.mrb[32].mxu1 %v407_v22 }
 0x103   :  { %1562 = vmatprep.mubr.f32.mxu1 %v408_v25 }
 0x106   :  { %1563 = vmatmul.mubr.f32.gmra.mrb[34].mxu1 %v409_v27 }
 0x107   :  { %1565 = vmatprep.mubr.f32.mxu1 %v410_v29 }
 0x10a   :  { %1566 = vmatmul.mubr.f32.gmra.mrb[36].mxu1 %v411_v31 }
 0x10b   :  { %1568 = vmatprep.mubr.f32.mxu1 %v412_v28 }
 0x10e   :  { %1569 = vmatmul.mubr.f32.gmra.mrb[38].mxu1 %v413_v34 }
 0x10f   :  { %1571 = vmatprep.mubr.f32.mxu1 %v414_v37 }
 0x112   :  { %1572 = vmatmul.mubr.f32.gmra.mrb[40].mxu1 %v415_v38 }
 0x113   :  { %1574 = vmatprep.mubr.f32.mxu1 %v416_v40 }
 0x116   :  { %1575 = vmatmul.mubr.f32.gmra.mrb[42].mxu1 %v417_v42 }
 0x117   :  { %1577 = vmatprep.mubr.f32.mxu1 %v418_v44 }
 0x11a   :  { %1578 = vmatmul.mubr.f32.gmra.mrb[44].mxu1 %v419_v46 }
 0x11b   :  { %1580 = vmatprep.mubr.f32.mxu1 %v420_v48 }
 0x11e   :  { %1581 = vmatmul.mubr.f32.gmra.mrb[46].mxu1 %v421_v49 }
 0x1b5   :  { %v1537_v53 = vpop.f32.mrb[16].mxu1 }
 0x1b6   :  { %v517_v54 = vadd.f32 %v1537_v53, %v2222_v16  ;;  %v511_v55 = vpop.f32.mrb[17].mxu1 }
 0x1b7   :  { %v512_v56 = vadd.f32 %v2222_v16, %v511_v55 }
 0x1b8   :  { %v671_v59 = vmax.f32 %v517_v54, 0.0 }
 0x1b9   :  { %v670_v57 = vmax.f32 %v512_v56, 0.0  ;;  %v1540_v58 = vpop.f32.mrb[18].mxu1 }
 0x1ba   :  { %v527_v60 = vadd.f32 %v1540_v58, %v2222_v16  ;;  %v521_v61 = vpop.f32.mrb[19].mxu1 }
 0x1bb   :  { %v522_v62 = vadd.f32 %v2222_v16, %v521_v61  ;;  %1615 = vmatprep.mubr.f32.mxu0 %v670_v57 }
 0x1bc   :  { %1616 = vmatmul.mubr.f32.vlgmr.msra.gmra.mrb[16].mxu0 %v671_v59  ;;  %v673_v1 = vmax.f32 %v527_v60, 0.0 }
 0x1bd   :  { %v672_v63 = vmax.f32 %v522_v62, 0.0  ;;  %v1543_v0 = vpop.f32.mrb[20].mxu1 }
 0x1be   :  { %v537_v2 = vadd.f32 %v1543_v0, %v2222_v16  ;;  %v531_v3 = vpop.f32.mrb[21].mxu1 }
 0x1bf   :  { %v532_v4 = vadd.f32 %v2222_v16, %v531_v3  ;;  %1618 = vmatprep.mubr.f32.mxu0 %v672_v63 }
 0x1c0   :  { %v675_v5 = vmax.f32 %v537_v2, 0.0  ;;  %1619 = vmatmul.mubr.f32.gmra.mrb[18].mxu0 %v673_v1 }
 0x1c1   :  { %v674_v6 = vmax.f32 %v532_v4, 0.0  ;;  %v1546_v7 = vpop.f32.mrb[22].mxu1 }
 0x1c2   :  { %v547_v8 = vadd.f32 %v1546_v7, %v2222_v16  ;;  %v541_v9 = vpop.f32.mrb[23].mxu1 }
 0x1c3   :  { %v542_v10 = vadd.f32 %v2222_v16, %v541_v9  ;;  %1621 = vmatprep.mubr.f32.mxu0 %v674_v6 }
 0x1c4   :  { %v677_v11 = vmax.f32 %v547_v8, 0.0  ;;  %1622 = vmatmul.mubr.f32.gmra.mrb[20].mxu0 %v675_v5 }
 0x1c5   :  { %v676_v12 = vmax.f32 %v542_v10, 0.0  ;;  %v1549_v13 = vpop.f32.mrb[24].mxu1 }
 0x1c6   :  { %v557_v14 = vadd.f32 %v1549_v13, %v2222_v16  ;;  %v551_v15 = vpop.f32.mrb[25].mxu1 }
 0x1c7   :  { %v552_v17 = vadd.f32 %v2222_v16, %v551_v15  ;;  %1624 = vmatprep.mubr.f32.mxu0 %v676_v12 }
 0x1c8   :  { %v679_v18 = vmax.f32 %v557_v14, 0.0  ;;  %1625 = vmatmul.mubr.f32.gmra.mrb[22].mxu0 %v677_v11 }
 0x1c9   :  { %v678_v19 = vmax.f32 %v552_v17, 0.0  ;;  %v1552_v21 = vpop.f32.mrb[26].mxu1 }
 0x1ca   :  { %v567_v23 = vadd.f32 %v1552_v21, %v2222_v16  ;;  %v561_v22 = vpop.f32.mrb[27].mxu1 }
 0x1cb   :  { %v562_v24 = vadd.f32 %v2222_v16, %v561_v22  ;;  %1627 = vmatprep.mubr.f32.mxu0 %v678_v19 }
 0x1cc   :  { %v681_v25 = vmax.f32 %v567_v23, 0.0  ;;  %1628 = vmatmul.mubr.f32.gmra.mrb[24].mxu0 %v679_v18 }
 0x1cd   :  { %v680_v26 = vmax.f32 %v562_v24, 0.0  ;;  %v1555_v27 = vpop.f32.mrb[28].mxu1  ;;  %v2259_v24 = vld [vmem:[%s2567_s6] ss:$0 sm:$0xff]  ;;  %s1888_s6 = smov [#allocation2]  }
 0x1ce   :  { %v577_v20 = vadd.f32 %v1555_v27, %v2222_v16  ;;  %v571_v29 = vpop.f32.mrb[29].mxu1  ;;  %s1275_s11 = sshll.u32 %s1888_s6, 4  ;;  %s1276_s11 = int_to_ptr.vmem [resolvable:$true] %s1275_s11 }
 0x1cf   :  { %v572_v30 = vadd.f32 %v2222_v16, %v571_v29  ;;  %1630 = vmatprep.mubr.f32.mxu0 %v680_v26  ;;  %s1864_s12 = scalar_lea.vmem %s1276_s11, 4096  ;;  %p1869_p1 = scmp.lt.s32.totalorder %s1276_s11, %s1276_s11 }
 0x1d0   :  { %v683_v31 = vmax.f32 %v577_v20, 0.0  ;;  %1631 = vmatmul.mubr.f32.gmra.mrb[26].mxu0 %v681_v25  ;;  %p1865_p0 = scmp.ne.s32.totalorder %s1276_s11, %s1864_s12  ;;  %p1870_p2 = scmp.lt.s32.totalorder %s1864_s12, %s1864_s12 }
 0x1d1   :  { %v682_v32 = vmax.f32 %v572_v30, 0.0  ;;  %v1558_v28 = vpop.f32.mrb[30].mxu1 }
 0x1d2   :  { %v587_v33 = vadd.f32 %v1558_v28, %v2222_v16  ;;  %v581_v34 = vpop.f32.mrb[31].mxu1  ;;  %p1871_p3 = por %p1870_p2, %p1869_p1 }
 0x1d3   :  { %v582_v35 = vadd.f32 %v2222_v16, %v581_v34  ;;  %1633 = vmatprep.mubr.f32.mxu0 %v682_v32 }
 0x1d4   :  { %v685_v37 = vmax.f32 %v587_v33, 0.0  ;;  %1634 = vmatmul.mubr.f32.gmra.mrb[28].mxu0 %v683_v31  ;;  %p1872_p4 = pnand %p1871_p3, %p1865_p0 }
 0x1d5   :  { %v684_v36 = vmax.f32 %v582_v35, 0.0  ;;  %v1561_v38 = vpop.f32.mrb[32].mxu1 }
 0x1d6   :  { %v597_v39 = vadd.f32 %v1561_v38, %v2222_v16  ;;  %v591_v40 = vpop.f32.mrb[33].mxu1 }
 0x1d7   :  { %v592_v41 = vadd.f32 %v2222_v16, %v591_v40  ;;  %1636 = vmatprep.mubr.f32.mxu0 %v684_v36 }
 0x1d8   :  { %v687_v42 = vmax.f32 %v597_v39, 0.0  ;;  %1637 = vmatmul.mubr.f32.gmra.mrb[30].mxu0 %v685_v37 }
 0x1d9   :  { %v686_v43 = vmax.f32 %v592_v41, 0.0  ;;  %v1564_v44 = vpop.f32.mrb[34].mxu1 }
 0x1da   :  { %v607_v45 = vadd.f32 %v1564_v44, %v2222_v16  ;;  %v601_v46 = vpop.f32.mrb[35].mxu1 }
 0x1db   :  { %v602_v47 = vadd.f32 %v2222_v16, %v601_v46  ;;  %1639 = vmatprep.mubr.f32.mxu0 %v686_v43 }
 0x1dc   :  { %v689_v48 = vmax.f32 %v607_v45, 0.0  ;;  %1640 = vmatmul.mubr.f32.gmra.mrb[32].mxu0 %v687_v42 }
 0x1dd   :  { %v688_v49 = vmax.f32 %v602_v47, 0.0  ;;  %v1567_v50 = vpop.f32.mrb[36].mxu1 }
 0x1de   :  { %v617_v51 = vadd.f32 %v1567_v50, %v2222_v16  ;;  %v611_v52 = vpop.f32.mrb[37].mxu1 }
 0x1df   :  { %v612_v53 = vadd.f32 %v2222_v16, %v611_v52  ;;  %1642 = vmatprep.mubr.f32.mxu0 %v688_v49 }
 0x1e0   :  { %v691_v54 = vmax.f32 %v617_v51, 0.0  ;;  %1643 = vmatmul.mubr.f32.gmra.mrb[34].mxu0 %v689_v48 }
 0x1e1   :  { %v690_v55 = vmax.f32 %v612_v53, 0.0  ;;  %v1570_v56 = vpop.f32.mrb[38].mxu1 }
 0x1e2   :  { %v627_v57 = vadd.f32 %v1570_v56, %v2222_v16  ;;  %v621_v58 = vpop.f32.mrb[39].mxu1 }
 0x1e3   :  { %v622_v59 = vadd.f32 %v2222_v16, %v621_v58  ;;  %1645 = vmatprep.mubr.f32.mxu0 %v690_v55 }
 0x1e4   :  { %v693_v60 = vmax.f32 %v627_v57, 0.0  ;;  %1646 = vmatmul.mubr.f32.gmra.mrb[36].mxu0 %v691_v54 }
 0x1e5   :  { %v692_v61 = vmax.f32 %v622_v59, 0.0  ;;  %v1573_v62 = vpop.f32.mrb[40].mxu1 }
 0x1e6   :  { %v637_v63 = vadd.f32 %v1573_v62, %v2222_v16  ;;  %v631_v0 = vpop.f32.mrb[41].mxu1 }
 0x1e7   :  { %v632_v1 = vadd.f32 %v2222_v16, %v631_v0  ;;  %1648 = vmatprep.mubr.f32.mxu0 %v692_v61 }
 0x1e8   :  { %v695_v2 = vmax.f32 %v637_v63, 0.0  ;;  %1649 = vmatmul.mubr.f32.gmra.mrb[38].mxu0 %v693_v60 }
 0x1e9   :  { %v694_v3 = vmax.f32 %v632_v1, 0.0  ;;  %v1576_v4 = vpop.f32.mrb[42].mxu1 }
 0x1ea   :  { %v647_v5 = vadd.f32 %v1576_v4, %v2222_v16  ;;  %v641_v6 = vpop.f32.mrb[43].mxu1 }
 0x1eb   :  { %v642_v7 = vadd.f32 %v2222_v16, %v641_v6  ;;  %1651 = vmatprep.mubr.f32.mxu0 %v694_v3 }
 0x1ec   :  { %v697_v8 = vmax.f32 %v647_v5, 0.0  ;;  %1652 = vmatmul.mubr.f32.gmra.mrb[40].mxu0 %v695_v2 }
 0x1ed   :  { %v696_v9 = vmax.f32 %v642_v7, 0.0  ;;  %v1579_v10 = vpop.f32.mrb[44].mxu1 }
 0x1ee   :  { %v657_v11 = vadd.f32 %v1579_v10, %v2222_v16  ;;  %v651_v12 = vpop.f32.mrb[45].mxu1 }
 0x1ef   :  { %v652_v13 = vadd.f32 %v2222_v16, %v651_v12  ;;  %1654 = vmatprep.mubr.f32.mxu0 %v696_v9 }
 0x1f0   :  { %v699_v14 = vmax.f32 %v657_v11, 0.0  ;;  %1655 = vmatmul.mubr.f32.gmra.mrb[42].mxu0 %v697_v8 }
 0x1f1   :  { %v698_v15 = vmax.f32 %v652_v13, 0.0  ;;  %v1582_v17 = vpop.f32.mrb[46].mxu1 }
 0x1f2   :  { %v667_v18 = vadd.f32 %v1582_v17, %v2222_v16  ;;  %v661_v19 = vpop.f32.mrb[47].mxu1 }
 0x1f3   :  { %v662_v21 = vadd.f32 %v2222_v16, %v661_v19  ;;  %1657 = vmatprep.mubr.f32.mxu0 %v698_v15 }
 0x1f4   :  { %v701_v23 = vmax.f32 %v667_v18, 0.0  ;;  %1658 = vmatmul.mubr.f32.gmra.mrb[44].mxu0 %v699_v14 }
 0x1f5   :  { %v700_v22 = vmax.f32 %v662_v21, 0.0 }
 0x1f7   :  { %1660 = vmatprep.mubr.f32.mxu0 %v700_v22 }
 0x1f8   :  { %1661 = vmatmul.mubr.f32.gmra.mrb[46].mxu0 %v701_v23 }
 0x28f   :  { %v1617_v25 = vpop.f32.mrb[16].mxu0 }
 0x290   :  { %v2262_v26 = vadd.f32 %v1617_v25, %v2259_v24  ;;  %v791_v27 = vpop.f32.mrb[17].mxu0 }
 0x291   :  { %v2266_v16 = vadd.f32 %v2259_v24, %v791_v27 }
 0x292   :  { %952 = vmax.xlane.f32.xlu0 %v2262_v26 }
 0x293   :  { %v1620_v20 = vpop.f32.mrb[18].mxu0 }
 0x294   :  { %v2269_v29 = vadd.f32 %v1620_v20, %v2259_v24  ;;  %v801_v30 = vpop.f32.mrb[19].mxu0 }
 0x295   :  { %v2274_v32 = vadd.f32 %v2259_v24, %v801_v30 }
 0x296   :  { %956 = vmax.xlane.f32.xlu1 %v2269_v29  ;;  %950 = vmax.xlane.f32.xlu0 %v2266_v16 }
 0x297   :  { %v1623_v31 = vpop.f32.mrb[20].mxu0 }
 0x298   :  { %v811_v28 = vpop.f32.mrb[21].mxu0  ;;  %v2282_v35 = vadd.f32 %v1623_v31, %v2259_v24 }
 0x299   :  { %v2277_v33 = vadd.f32 %v2259_v24, %v811_v28 }
 0x29a   :  { %954 = vmax.xlane.f32.xlu1 %v2274_v32 }
 0x29b   :  { %v1626_v34 = vpop.f32.mrb[22].mxu0  ;;  %958 = vmax.xlane.f32.xlu0 %v2277_v33 }
 0x29c   :  { %v821_v37 = vpop.f32.mrb[23].mxu0  ;;  %v2290_v39 = vadd.f32 %v1626_v34, %v2259_v24 }
 0x29d   :  { %v2285_v36 = vadd.f32 %v2259_v24, %v821_v37 }
 0x29e   :  { %960 = vmax.xlane.f32.xlu1 %v2282_v35 }
 0x29f   :  { %v1629_v38 = vpop.f32.mrb[24].mxu0  ;;  %962 = vmax.xlane.f32.xlu0 %v2285_v36 }
 0x2a0   :  { %v831_v40 = vpop.f32.mrb[25].mxu0  ;;  %v2298_v43 = vadd.f32 %v1629_v38, %v2259_v24 }
 0x2a1   :  { %v2293_v41 = vadd.f32 %v2259_v24, %v831_v40 }
 0x2a2   :  { %964 = vmax.xlane.f32.xlu1 %v2290_v39 }
 0x2a3   :  { %v1632_v42 = vpop.f32.mrb[26].mxu0  ;;  %966 = vmax.xlane.f32.xlu0 %v2293_v41 }
 0x2a4   :  { %v841_v44 = vpop.f32.mrb[27].mxu0  ;;  %v2306_v47 = vadd.f32 %v1632_v42, %v2259_v24 }
 0x2a5   :  { %v2301_v45 = vadd.f32 %v2259_v24, %v841_v44 }
 0x2a6   :  { %968 = vmax.xlane.f32.xlu1 %v2298_v43 }
 0x2a7   :  { %v1635_v46 = vpop.f32.mrb[28].mxu0  ;;  %970 = vmax.xlane.f32.xlu0 %v2301_v45 }
 0x2a8   :  { %v851_v48 = vpop.f32.mrb[29].mxu0  ;;  %v2314_v51 = vadd.f32 %v1635_v46, %v2259_v24 }
 0x2a9   :  { %v2309_v49 = vadd.f32 %v2259_v24, %v851_v48 }
 0x2aa   :  { %972 = vmax.xlane.f32.xlu1 %v2306_v47 }
 0x2ab   :  { %v1638_v50 = vpop.f32.mrb[30].mxu0  ;;  %974 = vmax.xlane.f32.xlu0 %v2309_v49 }
 0x2ac   :  { %v861_v52 = vpop.f32.mrb[31].mxu0  ;;  %v2322_v55 = vadd.f32 %v1638_v50, %v2259_v24 }
 0x2ad   :  { %v2317_v53 = vadd.f32 %v2259_v24, %v861_v52 }
 0x2ae   :  { %976 = vmax.xlane.f32.xlu1 %v2314_v51 }
 0x2af   :  { %v1641_v54 = vpop.f32.mrb[32].mxu0  ;;  %978 = vmax.xlane.f32.xlu0 %v2317_v53 }
 0x2b0   :  { %v871_v56 = vpop.f32.mrb[33].mxu0  ;;  %v2330_v59 = vadd.f32 %v1641_v54, %v2259_v24 }
 0x2b1   :  { %v2325_v57 = vadd.f32 %v2259_v24, %v871_v56 }
 0x2b2   :  { %980 = vmax.xlane.f32.xlu1 %v2322_v55 }
 0x2b3   :  { %v1644_v58 = vpop.f32.mrb[34].mxu0  ;;  %982 = vmax.xlane.f32.xlu0 %v2325_v57 }
 0x2b4   :  { %v881_v60 = vpop.f32.mrb[35].mxu0  ;;  %v2338_v63 = vadd.f32 %v1644_v58, %v2259_v24 }
 0x2b5   :  { %v2333_v61 = vadd.f32 %v2259_v24, %v881_v60 }
 0x2b6   :  { %984 = vmax.xlane.f32.xlu1 %v2330_v59 }
 0x2b7   :  { %v1647_v62 = vpop.f32.mrb[36].mxu0  ;;  %986 = vmax.xlane.f32.xlu0 %v2333_v61 }
 0x2b8   :  { %v891_v0 = vpop.f32.mrb[37].mxu0  ;;  %v2346_v3 = vadd.f32 %v1647_v62, %v2259_v24 }
 0x2b9   :  { %v2341_v1 = vadd.f32 %v2259_v24, %v891_v0 }
 0x2ba   :  { %988 = vmax.xlane.f32.xlu1 %v2338_v63 }
 0x2bb   :  { %v1650_v2 = vpop.f32.mrb[38].mxu0  ;;  %990 = vmax.xlane.f32.xlu0 %v2341_v1 }
 0x2bc   :  { %v901_v4 = vpop.f32.mrb[39].mxu0  ;;  %v2354_v7 = vadd.f32 %v1650_v2, %v2259_v24 }
 0x2bd   :  { %v2349_v5 = vadd.f32 %v2259_v24, %v901_v4 }
 0x2be   :  { %992 = vmax.xlane.f32.xlu1 %v2346_v3 }
 0x2bf   :  { %v1653_v6 = vpop.f32.mrb[40].mxu0  ;;  %994 = vmax.xlane.f32.xlu0 %v2349_v5 }
 0x2c0   :  { %v911_v8 = vpop.f32.mrb[41].mxu0  ;;  %v2362_v11 = vadd.f32 %v1653_v6, %v2259_v24 }
 0x2c1   :  { %v2357_v9 = vadd.f32 %v2259_v24, %v911_v8 }
 0x2c2   :  { %996 = vmax.xlane.f32.xlu1 %v2354_v7 }
 0x2c3   :  { %v1656_v10 = vpop.f32.mrb[42].mxu0  ;;  %998 = vmax.xlane.f32.xlu0 %v2357_v9 }
 0x2c4   :  { %v921_v12 = vpop.f32.mrb[43].mxu0  ;;  %v2370_v15 = vadd.f32 %v1656_v10, %v2259_v24 }
 0x2c5   :  { %v2365_v13 = vadd.f32 %v2259_v24, %v921_v12 }
 0x2c6   :  { %1000 = vmax.xlane.f32.xlu1 %v2362_v11 }
 0x2c7   :  { %v1659_v14 = vpop.f32.mrb[44].mxu0  ;;  %1002 = vmax.xlane.f32.xlu0 %v2365_v13 }
 0x2c8   :  { %v931_v17 = vpop.f32.mrb[45].mxu0  ;;  %v2378_v21 = vadd.f32 %v1659_v14, %v2259_v24 }
 0x2c9   :  { %v2373_v18 = vadd.f32 %v2259_v24, %v931_v17 }
 0x2ca   :  { %1004 = vmax.xlane.f32.xlu1 %v2370_v15 }
 0x2cb   :  { %v1662_v19 = vpop.f32.mrb[46].mxu0  ;;  %1006 = vmax.xlane.f32.xlu0 %v2373_v18 }
 0x2cc   :  { %v2381_v23 = vadd.f32 %v1662_v19, %v2259_v24  ;;  %v941_v22 = vpop.f32.mrb[47].mxu0 }
 0x2cd   :  { %v2384_v25 = vadd.f32 %v2259_v24, %v941_v22 }
 0x2ce   :  { %1008 = vmax.xlane.f32.xlu1 %v2378_v21 }
 0x2cf   :  { %1010 = vmax.xlane.f32.xlu0 %v2384_v25 }
 0x2d2   :  { %1012 = vmax.xlane.f32.xlu1 %v2381_v23 }
 0x31f   :  { %v953_v27 = vpop.xlane.xlu0 %952 }
 0x320   :  { %v1015_v20 = vsub.f32 %v2262_v26, %v953_v27 }
 0x322   :  { %v1048_v30 = vmul.f32 1.442695, %v1015_v20 }
 0x323   :  { %v957_v31 = vpop.xlane.xlu1 %956  ;;  %v951_v28 = vpop.xlane.xlu0 %950 }
 0x324   :  { %1736 = vpow2.f32 %v1048_v30  ;;  %v1017_v34 = vsub.f32 %v2269_v29, %v957_v31  ;;  %v1014_v37 = vsub.f32 %v2266_v16, %v951_v28 }
 0x326   :  { %v1052_v38 = vmul.f32 1.442695, %v1017_v34  ;;  %v1046_v24 = vmul.f32 1.442695, %v1014_v37 }
 0x327   :  { %v955_v40 = vpop.xlane.xlu1 %954 }
 0x328   :  { %1738 = vpow2.f32 %v1052_v38  ;;  %v1016_v42 = vsub.f32 %v2274_v32, %v955_v40  ;;  %v959_v44 = vpop.xlane.xlu0 %958 }
 0x329   :  { %1740 = vpow2.f32 %v1046_v24  ;;  %v1018_v46 = vsub.f32 %v2277_v33, %v959_v44 }
 0x32a   :  { %v1050_v48 = vmul.f32 1.442695, %v1016_v42 }
 0x32b   :  { %v961_v26 = vpop.xlane.xlu1 %960  ;;  %v1054_v54 = vmul.f32 1.442695, %v1018_v46 }
 0x32c   :  { %1742 = vpow2.f32 %v1050_v48  ;;  %v1019_v50 = vsub.f32 %v2282_v35, %v961_v26  ;;  %v963_v52 = vpop.xlane.xlu0 %962 }
 0x32d   :  { %v1020_v29 = vsub.f32 %v2285_v36, %v963_v52 }
 0x32e   :  { %v2396_v16 = vpop.eup %1736  ;;  %v1056_v56 = vmul.f32 1.442695, %v1019_v50 }
 0x32f   :  { %1112 = vadd.xlane.f32.xlu1 %v2396_v16  ;;  %v965_v58 = vpop.xlane.xlu1 %964  ;;  %v1058_v33 = vmul.f32 1.442695, %v1020_v29 }
 0x330   :  { %1744 = vpow2.f32 %v1056_v56  ;;  %v1021_v32 = vsub.f32 %v2290_v39, %v965_v58  ;;  %v967_v60 = vpop.xlane.xlu0 %966 }
 0x331   :  { %1746 = vpow2.f32 %v1054_v54  ;;  %v1022_v62 = vsub.f32 %v2293_v41, %v967_v60 }
 0x332   :  { %v2401_v0 = vpop.eup %1738  ;;  %v1060_v35 = vmul.f32 1.442695, %v1021_v32 }
 0x333   :  { %v2403_v2 = vpop.eup %1740  ;;  %1116 = vadd.xlane.f32.xlu1 %v2401_v0  ;;  %v969_v36 = vpop.xlane.xlu1 %968  ;;  %v1062_v39 = vmul.f32 1.442695, %v1022_v62 }
 0x334   :  { %1748 = vpow2.f32 %v1060_v35  ;;  %v1023_v4 = vsub.f32 %v2298_v43, %v969_v36  ;;  %1110 = vadd.xlane.f32.xlu0 %v2403_v2  ;;  %v971_v6 = vpop.xlane.xlu0 %970 }
 0x335   :  { %1750 = vpow2.f32 %v1058_v33  ;;  %v1024_v8 = vsub.f32 %v2301_v45, %v971_v6 }
 0x336   :  { %v2409_v10 = vpop.eup %1742  ;;  %v1064_v41 = vmul.f32 1.442695, %v1023_v4 }
 0x337   :  { %v973_v12 = vpop.xlane.xlu1 %972  ;;  %v1066_v19 = vmul.f32 1.442695, %v1024_v8 }
 0x338   :  { %1752 = vpow2.f32 %v1064_v41  ;;  %v1025_v14 = vsub.f32 %v2306_v47, %v973_v12  ;;  %1114 = vadd.xlane.f32.xlu0 %v2409_v10  ;;  %v975_v17 = vpop.xlane.xlu0 %974 }
 0x339   :  { %1754 = vpow2.f32 %v1062_v39  ;;  %v1026_v43 = vsub.f32 %v2309_v49, %v975_v17 }
 0x33a   :  { %v2414_v22 = vpop.eup %1744  ;;  %v1068_v27 = vmul.f32 1.442695, %v1025_v14 }
 0x33b   :  { %v2416_v20 = vpop.eup %1746  ;;  %1120 = vadd.xlane.f32.xlu1 %v2414_v22  ;;  %v977_v45 = vpop.xlane.xlu1 %976  ;;  %v1070_v31 = vmul.f32 1.442695, %v1026_v43 }
 0x33c   :  { %1756 = vpow2.f32 %v1068_v27  ;;  %v1027_v30 = vsub.f32 %v2314_v51, %v977_v45  ;;  %1118 = vadd.xlane.f32.xlu0 %v2416_v20  ;;  %v979_v47 = vpop.xlane.xlu0 %978 }
 0x33d   :  { %1758 = vpow2.f32 %v1066_v19  ;;  %v1028_v28 = vsub.f32 %v2317_v53, %v979_v47 }
 0x33e   :  { %v2422_v34 = vpop.eup %1748  ;;  %v1072_v49 = vmul.f32 1.442695, %v1027_v30 }
 0x33f   :  { %v2424_v37 = vpop.eup %1750  ;;  %1124 = vadd.xlane.f32.xlu1 %v2422_v34  ;;  %v981_v38 = vpop.xlane.xlu1 %980  ;;  %v1074_v40 = vmul.f32 1.442695, %v1028_v28 }
 0x340   :  { %1760 = vpow2.f32 %v1072_v49  ;;  %v1029_v24 = vsub.f32 %v2322_v55, %v981_v38  ;;  %1122 = vadd.xlane.f32.xlu0 %v2424_v37  ;;  %v983_v51 = vpop.xlane.xlu0 %982 }
 0x341   :  { %1762 = vpow2.f32 %v1070_v31  ;;  %v1030_v42 = vsub.f32 %v2325_v57, %v983_v51 }
 0x342   :  { %v2430_v44 = vpop.eup %1752  ;;  %v1076_v53 = vmul.f32 1.442695, %v1029_v24 }
 0x343   :  { %v2432_v46 = vpop.eup %1754  ;;  %1128 = vadd.xlane.f32.xlu1 %v2430_v44  ;;  %v985_v48 = vpop.xlane.xlu1 %984  ;;  %v1078_v50 = vmul.f32 1.442695, %v1030_v42 }
 0x344   :  { %1764 = vpow2.f32 %v1076_v53  ;;  %v1031_v26 = vsub.f32 %v2330_v59, %v985_v48  ;;  %1126 = vadd.xlane.f32.xlu0 %v2432_v46  ;;  %v987_v55 = vpop.xlane.xlu0 %986 }
 0x345   :  { %1766 = vpow2.f32 %v1074_v40  ;;  %v1032_v52 = vsub.f32 %v2333_v61, %v987_v55 }
 0x346   :  { %v2438_v54 = vpop.eup %1756  ;;  %v1080_v57 = vmul.f32 1.442695, %v1031_v26 }
 0x347   :  { %v2440_v29 = vpop.eup %1758  ;;  %1132 = vadd.xlane.f32.xlu1 %v2438_v54  ;;  %v989_v56 = vpop.xlane.xlu1 %988  ;;  %v1082_v32 = vmul.f32 1.442695, %v1032_v52 }
 0x348   :  { %1768 = vpow2.f32 %v1080_v57  ;;  %v1033_v58 = vsub.f32 %v2338_v63, %v989_v56  ;;  %1130 = vadd.xlane.f32.xlu0 %v2440_v29  ;;  %v991_v59 = vpop.xlane.xlu0 %990 }
 0x349   :  { %1770 = vpow2.f32 %v1078_v50  ;;  %v1034_v60 = vsub.f32 %v2341_v1, %v991_v59 }
 0x34a   :  { %v2446_v33 = vpop.eup %1760  ;;  %v1084_v61 = vmul.f32 1.442695, %v1033_v58 }
 0x34b   :  { %v2448_v62 = vpop.eup %1762  ;;  %1136 = vadd.xlane.f32.xlu1 %v2446_v33  ;;  %v993_v35 = vpop.xlane.xlu1 %992  ;;  %v1086_v4 = vmul.f32 1.442695, %v1034_v60 }
 0x34c   :  { %1772 = vpow2.f32 %v1084_v61  ;;  %v1035_v36 = vsub.f32 %v2346_v3, %v993_v35  ;;  %1134 = vadd.xlane.f32.xlu0 %v2448_v62  ;;  %v995_v63 = vpop.xlane.xlu0 %994 }
 0x34d   :  { %1774 = vpow2.f32 %v1082_v32  ;;  %v1036_v6 = vsub.f32 %v2349_v5, %v995_v63 }
 0x34e   :  { %v2454_v39 = vpop.eup %1764  ;;  %v1088_v1 = vmul.f32 1.442695, %v1035_v36 }
 0x34f   :  { %v2456_v8 = vpop.eup %1766  ;;  %1140 = vadd.xlane.f32.xlu1 %v2454_v39  ;;  %v997_v41 = vpop.xlane.xlu1 %996  ;;  %v1090_v14 = vmul.f32 1.442695, %v1036_v6 }
 0x350   :  { %1776 = vpow2.f32 %v1088_v1  ;;  %v1037_v12 = vsub.f32 %v2354_v7, %v997_v41  ;;  %1138 = vadd.xlane.f32.xlu0 %v2456_v8  ;;  %v999_v3 = vpop.xlane.xlu0 %998 }
 0x351   :  { %1778 = vpow2.f32 %v1086_v4  ;;  %v1038_v17 = vsub.f32 %v2357_v9, %v999_v3 }
 0x352   :  { %v2462_v19 = vpop.eup %1768  ;;  %v1092_v5 = vmul.f32 1.442695, %v1037_v12 }
 0x353   :  { %v2464_v43 = vpop.eup %1770  ;;  %1144 = vadd.xlane.f32.xlu1 %v2462_v19  ;;  %v1001_v27 = vpop.xlane.xlu1 %1000  ;;  %v1094_v30 = vmul.f32 1.442695, %v1038_v17 }
 0x354   :  { %1780 = vpow2.f32 %v1092_v5  ;;  %v1039_v45 = vsub.f32 %v2362_v11, %v1001_v27  ;;  %1142 = vadd.xlane.f32.xlu0 %v2464_v43  ;;  %v1003_v7 = vpop.xlane.xlu0 %1002 }
 0x355   :  { %1782 = vpow2.f32 %v1090_v14  ;;  %v1040_v47 = vsub.f32 %v2365_v13, %v1003_v7 }
 0x356   :  { %v2470_v31 = vpop.eup %1772  ;;  %v1096_v9 = vmul.f32 1.442695, %v1039_v45 }
 0x357   :  { %v2472_v28 = vpop.eup %1774  ;;  %1148 = vadd.xlane.f32.xlu1 %v2470_v31  ;;  %v1005_v49 = vpop.xlane.xlu1 %1004  ;;  %v1098_v24 = vmul.f32 1.442695, %v1040_v47 }
 0x358   :  { %1784 = vpow2.f32 %v1096_v9  ;;  %v1041_v38 = vsub.f32 %v2370_v15, %v1005_v49  ;;  %1146 = vadd.xlane.f32.xlu0 %v2472_v28  ;;  %v1007_v11 = vpop.xlane.xlu0 %1006 }
 0x359   :  { %1786 = vpow2.f32 %v1094_v30  ;;  %v1042_v51 = vsub.f32 %v2373_v18, %v1007_v11 }
 0x35a   :  { %v2478_v40 = vpop.eup %1776  ;;  %v1100_v13 = vmul.f32 1.442695, %v1041_v38 }
 0x35b   :  { %v2480_v42 = vpop.eup %1778  ;;  %1152 = vadd.xlane.f32.xlu1 %v2478_v40  ;;  %v1009_v53 = vpop.xlane.xlu1 %1008  ;;  %v1102_v26 = vmul.f32 1.442695, %v1042_v51 }
 0x35c   :  { %1788 = vpow2.f32 %v1100_v13  ;;  %v1043_v48 = vsub.f32 %v2378_v21, %v1009_v53  ;;  %1150 = vadd.xlane.f32.xlu0 %v2480_v42  ;;  %v1011_v15 = vpop.xlane.xlu0 %1010 }
 0x35d   :  { %1790 = vpow2.f32 %v1098_v24  ;;  %v1044_v55 = vsub.f32 %v2384_v25, %v1011_v15 }
 0x35e   :  { %v2486_v50 = vpop.eup %1780  ;;  %v1104_v18 = vmul.f32 1.442695, %v1043_v48 }
 0x35f   :  { %v2488_v52 = vpop.eup %1782  ;;  %1156 = vadd.xlane.f32.xlu1 %v2486_v50  ;;  %v1013_v57 = vpop.xlane.xlu1 %1012  ;;  %v1106_v21 = vmul.f32 1.442695, %v1044_v55 }
 0x360   :  { %1792 = vpow2.f32 %v1104_v18  ;;  %v1045_v56 = vsub.f32 %v2381_v23, %v1013_v57  ;;  %1154 = vadd.xlane.f32.xlu0 %v2488_v52 }
 0x361   :  { %1794 = vpow2.f32 %v1102_v26 }
 0x362   :  { %v2493_v58 = vpop.eup %1784  ;;  %v1108_v59 = vmul.f32 1.442695, %v1045_v56 }
 0x363   :  { %v2495_v32 = vpop.eup %1786  ;;  %1160 = vadd.xlane.f32.xlu1 %v2493_v58 }
 0x364   :  { %1796 = vpow2.f32 %v1108_v59  ;;  %1158 = vadd.xlane.f32.xlu0 %v2495_v32 }
 0x365   :  { %1798 = vpow2.f32 %v1106_v21 }
 0x366   :  { %v2499_v25 = vpop.eup %1788 }
 0x367   :  { %v2501_v60 = vpop.eup %1790  ;;  %1164 = vadd.xlane.f32.xlu1 %v2499_v25 }
 0x368   :  { %1162 = vadd.xlane.f32.xlu0 %v2501_v60 }
 0x36a   :  { %v2505_v23 = vpop.eup %1792 }
 0x36b   :  { %v2507_v61 = vpop.eup %1794  ;;  %1168 = vadd.xlane.f32.xlu1 %v2505_v23 }
 0x36c   :  { %1166 = vadd.xlane.f32.xlu0 %v2507_v61 }
 0x36e   :  { %v2511_v35 = vpop.eup %1796 }
 0x36f   :  { %v2513_v36 = vpop.eup %1798  ;;  %1172 = vadd.xlane.f32.xlu1 %v2511_v35 }
 0x370   :  { %1170 = vadd.xlane.f32.xlu0 %v2513_v36 }
 0x3bc   :  { %v1113_v63 = vpop.xlane.xlu1 %1112 }
 0x3bd   :  { %1800 = vrcp.f32 %v1113_v63 }
 0x3c0   :  { %v1117_v4 = vpop.xlane.xlu1 %1116 }
 0x3c1   :  { %1802 = vrcp.f32 %v1117_v4  ;;  %v1111_v6 = vpop.xlane.xlu0 %1110 }
 0x3c2   :  { %1804 = vrcp.f32 %v1111_v6 }
 0x3c5   :  { %v1115_v1 = vpop.xlane.xlu0 %1114 }
 0x3c6   :  { %1806 = vrcp.f32 %v1115_v1 }
 0x3c7   :  { %v1801_v41 = vpop.eup %1800 }
 0x3c8   :  { %v1177_v12 = vmul.f32 %v1801_v41, %v2396_v16  ;;  %v1121_v3 = vpop.xlane.xlu1 %1120 }
 0x3c9   :  { %1808 = vrcp.f32 %v1121_v3  ;;  %v1119_v14 = vpop.xlane.xlu0 %1118 }
 0x3ca   :  { %1239 = vst [vmem:[#allocation2 + $0x8] sm:$0xff] %v1177_v12  ;;  %1810 = vrcp.f32 %v1119_v14 }
 0x3cb   :  { %v1803_v17 = vpop.eup %1802 }
 0x3cc   :  { %v1805_v5 = vpop.eup %1804  ;;  %v1181_v27 = vmul.f32 %v1803_v17, %v2401_v0  ;;  %v1125_v45 = vpop.xlane.xlu1 %1124 }
 0x3cd   :  { %v1175_v7 = vmul.f32 %v1805_v5, %v2403_v2  ;;  %1812 = vrcp.f32 %v1125_v45  ;;  %v1123_v30 = vpop.xlane.xlu0 %1122 }
 0x3ce   :  { %1241 = vst [vmem:[#allocation2 + $0x18] sm:$0xff] %v1181_v27  ;;  %1814 = vrcp.f32 %v1123_v30 }
 0x3cf   :  { %1238 = vst [vmem:[#allocation2] sm:$0xff] %v1175_v7 }
 0x3d0   :  { %v1807_v47 = vpop.eup %1806  ;;  %v1129_v9 = vpop.xlane.xlu1 %1128 }
 0x3d1   :  { %v1179_v16 = vmul.f32 %v1807_v47, %v2409_v10  ;;  %1816 = vrcp.f32 %v1129_v9  ;;  %v1127_v49 = vpop.xlane.xlu0 %1126 }
 0x3d2   :  { %1818 = vrcp.f32 %v1127_v49 }
 0x3d3   :  { %v1809_v38 = vpop.eup %1808  ;;  %1240 = vst [vmem:[#allocation2 + $0x10] sm:$0xff] %v1179_v16 }
 0x3d4   :  { %v1811_v11 = vpop.eup %1810  ;;  %v1185_v0 = vmul.f32 %v1809_v38, %v2414_v22  ;;  %v1133_v24 = vpop.xlane.xlu1 %1132 }
 0x3d5   :  { %v1183_v2 = vmul.f32 %v1811_v11, %v2416_v20  ;;  %1820 = vrcp.f32 %v1133_v24  ;;  %v1131_v51 = vpop.xlane.xlu0 %1130 }
 0x3d6   :  { %1243 = vst [vmem:[#allocation2 + $0x28] sm:$0xff] %v1185_v0  ;;  %1822 = vrcp.f32 %v1131_v51 }
 0x3d7   :  { %v1813_v13 = vpop.eup %1812  ;;  %1242 = vst [vmem:[#allocation2 + $0x20] sm:$0xff] %v1183_v2 }
 0x3d8   :  { %v1815_v53 = vpop.eup %1814  ;;  %v1189_v10 = vmul.f32 %v1813_v13, %v2422_v34  ;;  %v1137_v48 = vpop.xlane.xlu1 %1136 }
 0x3d9   :  { %v1187_v15 = vmul.f32 %v1815_v53, %v2424_v37  ;;  %1824 = vrcp.f32 %v1137_v48  ;;  %v1135_v26 = vpop.xlane.xlu0 %1134 }
 0x3da   :  { %1245 = vst [vmem:[#allocation2 + $0x38] sm:$0xff] %v1189_v10  ;;  %1826 = vrcp.f32 %v1135_v26 }
 0x3db   :  { %v1817_v22 = vpop.eup %1816  ;;  %1244 = vst [vmem:[#allocation2 + $0x30] sm:$0xff] %v1187_v15 }
 0x3dc   :  { %v1819_v55 = vpop.eup %1818  ;;  %v1193_v20 = vmul.f32 %v1817_v22, %v2430_v44  ;;  %v1141_v18 = vpop.xlane.xlu1 %1140 }
 0x3dd   :  { %v1191_v57 = vmul.f32 %v1819_v55, %v2432_v46  ;;  %1828 = vrcp.f32 %v1141_v18  ;;  %v1139_v56 = vpop.xlane.xlu0 %1138 }
 0x3de   :  { %1247 = vst [vmem:[#allocation2 + $0x48] sm:$0xff] %v1193_v20  ;;  %1830 = vrcp.f32 %v1139_v56 }
 0x3df   :  { %v1821_v34 = vpop.eup %1820  ;;  %1246 = vst [vmem:[#allocation2 + $0x40] sm:$0xff] %v1191_v57 }
 0x3e0   :  { %v1823_v21 = vpop.eup %1822  ;;  %v1197_v37 = vmul.f32 %v1821_v34, %v2438_v54  ;;  %v1145_v59 = vpop.xlane.xlu1 %1144 }
 0x3e1   :  { %v1195_v63 = vmul.f32 %v1823_v21, %v2440_v29  ;;  %1832 = vrcp.f32 %v1145_v59  ;;  %v1143_v4 = vpop.xlane.xlu0 %1142 }
 0x3e2   :  { %1249 = vst [vmem:[#allocation2 + $0x58] sm:$0xff] %v1197_v37  ;;  %1834 = vrcp.f32 %v1143_v4 }
 0x3e3   :  { %v1825_v44 = vpop.eup %1824  ;;  %1248 = vst [vmem:[#allocation2 + $0x50] sm:$0xff] %v1195_v63 }
 0x3e4   :  { %v1827_v6 = vpop.eup %1826  ;;  %v1201_v46 = vmul.f32 %v1825_v44, %v2446_v33  ;;  %v1149_v1 = vpop.xlane.xlu1 %1148 }
 0x3e5   :  { %v1199_v41 = vmul.f32 %v1827_v6, %v2448_v62  ;;  %1836 = vrcp.f32 %v1149_v1  ;;  %v1147_v12 = vpop.xlane.xlu0 %1146 }
 0x3e6   :  { %1251 = vst [vmem:[#allocation2 + $0x68] sm:$0xff] %v1201_v46  ;;  %1838 = vrcp.f32 %v1147_v12 }
 0x3e7   :  { %v1829_v54 = vpop.eup %1828  ;;  %1250 = vst [vmem:[#allocation2 + $0x60] sm:$0xff] %v1199_v41 }
 0x3e8   :  { %v1831_v3 = vpop.eup %1830  ;;  %v1205_v29 = vmul.f32 %v1829_v54, %v2454_v39  ;;  %v1153_v14 = vpop.xlane.xlu1 %1152 }
 0x3e9   :  { %v1203_v17 = vmul.f32 %v1831_v3, %v2456_v8  ;;  %1840 = vrcp.f32 %v1153_v14  ;;  %v1151_v5 = vpop.xlane.xlu0 %1150 }
 0x3ea   :  { %1253 = vst [vmem:[#allocation2 + $0x78] sm:$0xff] %v1205_v29  ;;  %1842 = vrcp.f32 %v1151_v5 }
 0x3eb   :  { %v1833_v33 = vpop.eup %1832  ;;  %1252 = vst [vmem:[#allocation2 + $0x70] sm:$0xff] %v1203_v17 }
 0x3ec   :  { %v1835_v27 = vpop.eup %1834  ;;  %v1209_v62 = vmul.f32 %v1833_v33, %v2462_v19  ;;  %v1157_v45 = vpop.xlane.xlu1 %1156 }
 0x3ed   :  { %v1207_v7 = vmul.f32 %v1835_v27, %v2464_v43  ;;  %1844 = vrcp.f32 %v1157_v45  ;;  %v1155_v30 = vpop.xlane.xlu0 %1154 }
 0x3ee   :  { %1255 = vst [vmem:[#allocation2 + $0x88] sm:$0xff] %v1209_v62  ;;  %1846 = vrcp.f32 %v1155_v30 }
 0x3ef   :  { %v1837_v39 = vpop.eup %1836  ;;  %1254 = vst [vmem:[#allocation2 + $0x80] sm:$0xff] %v1207_v7 }
 0x3f0   :  { %v1839_v47 = vpop.eup %1838  ;;  %v1213_v8 = vmul.f32 %v1837_v39, %v2470_v31  ;;  %v1161_v9 = vpop.xlane.xlu1 %1160 }
 0x3f1   :  { %v1211_v16 = vmul.f32 %v1839_v47, %v2472_v28  ;;  %1848 = vrcp.f32 %v1161_v9  ;;  %v1159_v49 = vpop.xlane.xlu0 %1158 }
 0x3f2   :  { %1257 = vst [vmem:[#allocation2 + $0x98] sm:$0xff] %v1213_v8  ;;  %1850 = vrcp.f32 %v1159_v49 }
 0x3f3   :  { %v1841_v19 = vpop.eup %1840  ;;  %1256 = vst [vmem:[#allocation2 + $0x90] sm:$0xff] %v1211_v16 }
 0x3f4   :  { %v1843_v38 = vpop.eup %1842  ;;  %v1217_v43 = vmul.f32 %v1841_v19, %v2478_v40  ;;  %v1165_v11 = vpop.xlane.xlu1 %1164 }
 0x3f5   :  { %v1215_v0 = vmul.f32 %v1843_v38, %v2480_v42  ;;  %1852 = vrcp.f32 %v1165_v11  ;;  %v1163_v24 = vpop.xlane.xlu0 %1162 }
 0x3f6   :  { %1259 = vst [vmem:[#allocation2 + $0xa8] sm:$0xff] %v1217_v43  ;;  %1854 = vrcp.f32 %v1163_v24 }
 0x3f7   :  { %v1845_v31 = vpop.eup %1844  ;;  %1258 = vst [vmem:[#allocation2 + $0xa0] sm:$0xff] %v1215_v0 }
 0x3f8   :  { %v1847_v2 = vpop.eup %1846  ;;  %v1221_v28 = vmul.f32 %v1845_v31, %v2486_v50  ;;  %v1169_v51 = vpop.xlane.xlu1 %1168 }
 0x3f9   :  { %v1219_v13 = vmul.f32 %v1847_v2, %v2488_v52  ;;  %1856 = vrcp.f32 %v1169_v51  ;;  %v1167_v53 = vpop.xlane.xlu0 %1166 }
 0x3fa   :  { %1261 = vst [vmem:[#allocation2 + $0xb8] sm:$0xff] %v1221_v28  ;;  %1858 = vrcp.f32 %v1167_v53 }
 0x3fb   :  { %v1849_v40 = vpop.eup %1848  ;;  %1260 = vst [vmem:[#allocation2 + $0xb0] sm:$0xff] %v1219_v13 }
 0x3fc   :  { %v1851_v10 = vpop.eup %1850  ;;  %v1225_v42 = vmul.f32 %v1849_v40, %v2493_v58  ;;  %v1173_v48 = vpop.xlane.xlu1 %1172 }
 0x3fd   :  { %v1223_v15 = vmul.f32 %v1851_v10, %v2495_v32  ;;  %1860 = vrcp.f32 %v1173_v48  ;;  %v1171_v26 = vpop.xlane.xlu0 %1170 }
 0x3fe   :  { %1263 = vst [vmem:[#allocation2 + $0xc8] sm:$0xff] %v1225_v42  ;;  %1862 = vrcp.f32 %v1171_v26 }
 0x3ff   :  { %v1853_v50 = vpop.eup %1852  ;;  %1262 = vst [vmem:[#allocation2 + $0xc0] sm:$0xff] %v1223_v15 }
 0x400   :  { %v1855_v22 = vpop.eup %1854  ;;  %v1229_v52 = vmul.f32 %v1853_v50, %v2499_v25 }
 0x401   :  { %v1227_v55 = vmul.f32 %v1855_v22, %v2501_v60 }
 0x402   :  { %1265 = vst [vmem:[#allocation2 + $0xd8] sm:$0xff] %v1229_v52 }
 0x403   :  { %v1857_v20 = vpop.eup %1856  ;;  %1264 = vst [vmem:[#allocation2 + $0xd0] sm:$0xff] %v1227_v55 }
 0x404   :  { %v1859_v18 = vpop.eup %1858  ;;  %v1233_v58 = vmul.f32 %v1857_v20, %v2505_v23 }
 0x405   :  { %v1231_v57 = vmul.f32 %v1859_v18, %v2507_v61 }
 0x406   :  { %1267 = vst [vmem:[#allocation2 + $0xe8] sm:$0xff] %v1233_v58 }
 0x407   :  { %v1861_v32 = vpop.eup %1860  ;;  %1266 = vst [vmem:[#allocation2 + $0xe0] sm:$0xff] %v1231_v57 }
 0x408   :  { %v1863_v56 = vpop.eup %1862  ;;  %v1237_v34 = vmul.f32 %v1861_v32, %v2511_v35 }
 0x409   :  { %v1235_v25 = vmul.f32 %v1863_v56, %v2513_v36 }
 0x40a   :  { %1269 = vst [vmem:[#allocation2 + $0xf8] sm:$0xff] %v1237_v34 }
 0x40b   :  { %1268 = vst [vmem:[#allocation2 + $0xf0] sm:$0xff] %v1235_v25 }
 0x40c   :  { %1875 = shalt.err (!%p1872_p4)
}
 0x40d   :  { %s1876_s15 = scalar_lea.hbm %s2568_s7, 4096 }
 0x40e   :  { %p1877_p5 = scmp.ne.s32.totalorder %s2568_s7, %s1876_s15  ;;  %p1880_p6 = scmp.lt.u32.totalorder %s1876_s15, %s2568_s7 }
 0x410   :  { %p1882_p7 = pnand %p1880_p6, %p1877_p5 }
 0x412   :  { %1885 = shalt.err (!%p1882_p7)
}
 0x413   :  { %s1889_s20 = smov 128   ;;  %s1890_s21 = smov 8  }
 0x414   :  { %1281 = dma.vmem_to_hbm [thread:$0]  %s1276_s11, 4096, %s2568_s7, [#allocation3], %s1889_s20, %s1889_s20, %s1890_s21  }
 0x415   :  { %1886 = dma.done.wait [#allocation3], 4096  }
 0x416   :  { %1887 = vsyncadd [#allocation3], 4294963200 }
 0x417   :  { %1285 = vsyncpa [#allocation3], 1 }

</bundles_post_ra>
